<compile_context>
chip_gen: v6e
topology: v6e:2x2x1
jax: 0.10.0
libtpu: 0.0.40
codegen_flags: <defaults>
</compile_context>

<pallas_src>
import functools

import jax
import jax.numpy as jnp
from jax.experimental import pallas as pl
from jax.experimental.pallas import tpu as pltpu

NEG_SLOPE = 0.01      # nn.LeakyReLU default negative_slope
PACK = 4              # 4 logical rows packed per lane-dense (128-wide) row
DEFAULT_TB = 4096     # packed batch-tile rows (= 4*4096 logical rows per step)


def _leaky_relu(x):
    return jnp.where(x > 0, x, NEG_SLOPE * x)


def mlp_kernel(x_ref, w1_ref, b1_ref, w2_ref, b2_ref, w3_ref, b3_ref, o_ref):
    x = x_ref[...]
    h = _leaky_relu(
        jnp.dot(x, w1_ref[...], preferred_element_type=jnp.float32) + b1_ref[...])
    h = _leaky_relu(
        jnp.dot(h, w2_ref[...], preferred_element_type=jnp.float32) + b2_ref[...])
    o = jnp.dot(h, w3_ref[...], preferred_element_type=jnp.float32) + b3_ref[...]
    o_ref[...] = o.astype(o_ref.dtype)


def prepare_params(params):
    """One-time preprocessing: block-diagonal (4x packed) weights, tiled biases.

    PyTorch weights are (out, in); we build block_diag(W.T, ..., W.T) so a
    lane-packed row [x0|x1|x2|x3] maps to [x0@W.T|x1@W.T|x2@W.T|x3@W.T].
    """
    eye = jnp.eye(PACK, dtype=jnp.float32)

    def block_diag_t(w):                       # (out,in) -> (PACK*in, PACK*out)
        return jnp.kron(eye, jnp.asarray(w, jnp.float32).T)

    def tiled_bias(b):                         # (out,) -> (1, PACK*out)
        return jnp.tile(jnp.asarray(b, jnp.float32).reshape(1, -1), (1, PACK))

    return {
        "w1": block_diag_t(params["w1"]), "b1": tiled_bias(params["b1"]),
        "w2": block_diag_t(params["w2"]), "b2": tiled_bias(params["b2"]),
        "w3": block_diag_t(params["w3"]), "b3": tiled_bias(params["b3"]),
    }


def _round_up(n, m):
    return ((n + m - 1) // m) * m


@functools.partial(jax.jit, static_argnames=("block_batch",))
def classifier_forward(x, prep, block_batch=DEFAULT_TB):
    """x: (B, 32) float32. prep: output of prepare_params()."""
    assert block_batch % 8 == 0, "batch tile must be a multiple of 8 sublanes"
    B, d_in = x.shape
    d_packed = d_in * PACK                      # 128 lanes per packed row
    out_packed = prep["w3"].shape[1]            # PACK * output_dim
    out_dim = out_packed // PACK

    # Packed-row count, padded to the tile size (tile itself >= 8 sublanes).
    bp = -(-B // PACK)
    tb = min(block_batch, _round_up(bp, 8))
    bp_pad = _round_up(bp, tb)
    b_pad = bp_pad * PACK
    if b_pad != B:
        x = jnp.pad(x, ((0, b_pad - B), (0, 0)))
    xp = x.reshape(bp_pad, d_packed)            # free row-major lane packing

    grid = (bp_pad // tb,)

    # Weights/biases: full block, constant index -> resident in VMEM across grid.
    const = lambda shape: pl.BlockSpec(shape, lambda i: (0,) * len(shape))

    weight_bytes = 4 * (prep["w1"].size + prep["b1"].size + prep["w2"].size
                        + prep["b2"].size + prep["w3"].size + prep["b3"].size)
    cost = pl.CostEstimate(
        flops=2 * B * (32 * 32 + 32 * 8 + 8 * out_dim),
        transcendentals=0,
        bytes_accessed=B * d_in * 4 + B * out_dim * 4 + weight_bytes,
    )

    out = pl.pallas_call(
        mlp_kernel,
        out_shape=jax.ShapeDtypeStruct((bp_pad, out_packed), x.dtype),
        grid=grid,
        in_specs=[
            pl.BlockSpec((tb, d_packed), lambda i: (i, 0)),
            const(prep["w1"].shape),
            const(prep["b1"].shape),
            const(prep["w2"].shape),
            const(prep["b2"].shape),
            const(prep["w3"].shape),
            const(prep["b3"].shape),
        ],
        out_specs=pl.BlockSpec((tb, out_packed), lambda i: (i, 0)),
        compiler_params=pltpu.CompilerParams(
            dimension_semantics=("parallel",),
            vmem_limit_bytes=32 * 1024 * 1024,
        ),
        cost_estimate=cost,
    )(xp, prep["w1"], prep["b1"], prep["w2"], prep["b2"], prep["w3"], prep["b3"])

    out = out.reshape(b_pad, out_dim)           # unpack back to (B_pad, 2)
    return out[:B] if b_pad != B else out


def init_params(key, output_dim=2):
    """Deterministic synthetic init matching nn.Linear parameter shapes."""
    ks = jax.random.split(key, 6)

    def linear(kw, kb, fan_in, fan_out):
        bound = 1.0 / jnp.sqrt(fan_in)
        w = jax.random.uniform(kw, (fan_out, fan_in), jnp.float32, -bound, bound)
        b = jax.random.uniform(kb, (fan_out,), jnp.float32, -bound, bound)
        return w, b

    w1, b1 = linear(ks[0], ks[1], 32, 32)
    w2, b2 = linear(ks[2], ks[3], 32, 8)
    w3, b3 = linear(ks[4], ks[5], 8, output_dim)
    return {"w1": w1, "b1": b1, "w2": w2, "b2": b2, "w3": w3, "b3": b3}


def reference_forward(x, p):
    h = _leaky_relu(x @ p["w1"].T + p["b1"])
    h = _leaky_relu(h @ p["w2"].T + p["b2"])
    return h @ p["w3"].T + p["b3"]


if __name__ == "__main__":
    key = jax.random.PRNGKey(0)
    k_x, k_p, k_x2 = jax.random.split(key, 3)

    params = init_params(k_p, output_dim=2)
    prep = prepare_params(params)

    # Primary small-shape test (matches the module's intended use).
    batch = 8
    x = jax.random.normal(k_x, (batch, 32), jnp.float32)
    out = jax.block_until_ready(classifier_forward(x, prep))
    ref = reference_forward(x, params)
    assert out.shape == (batch, 2), out.shape
    assert jnp.allclose(out, ref, atol=1e-5, rtol=1e-5), "mismatch vs reference"

    # Secondary check: multi-tile grid + batch not a multiple of the 4x packing.
    batch2 = 50
    x2 = jax.random.normal(k_x2, (batch2, 32), jnp.float32)
    out2 = jax.block_until_ready(classifier_forward(x2, prep, block_batch=8))
    ref2 = reference_forward(x2, params)
    assert out2.shape == (batch2, 2), out2.shape
    assert jnp.allclose(out2, ref2, atol=1e-5, rtol=1e-5), "tiled mismatch vs reference"

    print("KERNEL_OK")
</pallas_src>

<mosaic_0001>
module attributes {stable_mosaic.version = 11 : i64} {
  func.func @mlp_kernel(%arg0: i32, %arg1: memref<8x128xf32, #tpu.memory_space<vmem>>, %arg2: memref<128x128xf32, #tpu.memory_space<vmem>>, %arg3: memref<1x128xf32, #tpu.memory_space<vmem>>, %arg4: memref<128x32xf32, #tpu.memory_space<vmem>>, %arg5: memref<1x32xf32, #tpu.memory_space<vmem>>, %arg6: memref<32x8xf32, #tpu.memory_space<vmem>>, %arg7: memref<1x8xf32, #tpu.memory_space<vmem>>, %arg8: memref<8x8xf32, #tpu.memory_space<vmem>>) attributes {dimension_semantics = [#tpu.dimension_semantics<parallel>], iteration_bounds = array<i64: 1>, scalar_prefetch = 0 : i64, scratch_operands = 0 : i64, tpu.core_type = #tpu.core_type<tc>, window_params = [{transform_indices = @transform_0, window_bounds = array<i64: 8, 128>}, {pipeline_mode = #tpu.pipeline_mode<synchronous>, transform_indices = @transform_1, window_bounds = array<i64: 128, 128>}, {pipeline_mode = #tpu.pipeline_mode<synchronous>, transform_indices = @transform_2, window_bounds = array<i64: 1, 128>}, {pipeline_mode = #tpu.pipeline_mode<synchronous>, transform_indices = @transform_3, window_bounds = array<i64: 128, 32>}, {pipeline_mode = #tpu.pipeline_mode<synchronous>, transform_indices = @transform_4, window_bounds = array<i64: 1, 32>}, {pipeline_mode = #tpu.pipeline_mode<synchronous>, transform_indices = @transform_5, window_bounds = array<i64: 32, 8>}, {pipeline_mode = #tpu.pipeline_mode<synchronous>, transform_indices = @transform_6, window_bounds = array<i64: 1, 8>}, {transform_indices = @transform_7, window_bounds = array<i64: 8, 8>}]} {
    %c0 = arith.constant 0 : index
    %c0_0 = arith.constant 0 : index
    %0 = vector.load %arg1[%c0, %c0_0] : memref<8x128xf32, #tpu.memory_space<vmem>>, vector<8x128xf32>
    %c0_1 = arith.constant 0 : index
    %c0_2 = arith.constant 0 : index
    %1 = vector.load %arg2[%c0_1, %c0_2] : memref<128x128xf32, #tpu.memory_space<vmem>>, vector<128x128xf32>
    %cst = arith.constant dense<0.000000e+00> : vector<8x128xf32>
    %2 = tpu.matmul %0, %1, %cst {dimension_numbers = #tpu.dot_dimension_numbers<[1], [0], [0], [1], [0, 0, 1, 1], [], []>} : vector<8x128xf32>, vector<128x128xf32>, vector<8x128xf32> -> vector<8x128xf32>
    %c0_3 = arith.constant 0 : index
    %c0_4 = arith.constant 0 : index
    %3 = vector.load %arg3[%c0_3, %c0_4] : memref<1x128xf32, #tpu.memory_space<vmem>>, vector<1x128xf32>
    %4 = vector.broadcast %3 : vector<1x128xf32> to vector<8x128xf32>
    %5 = arith.addf %2, %4 : vector<8x128xf32>
    %cst_5 = arith.constant 0.000000e+00 : f32
    %6 = vector.broadcast %cst_5 : f32 to vector<8x128xf32>
    %7 = arith.cmpf ogt, %5, %6 : vector<8x128xf32>
    %cst_6 = arith.constant 0.00999999977 : f32
    %8 = vector.broadcast %cst_6 : f32 to vector<8x128xf32>
    %9 = arith.mulf %8, %5 : vector<8x128xf32>
    %10 = arith.select %7, %5, %9 : vector<8x128xi1>, vector<8x128xf32>
    %c0_7 = arith.constant 0 : index
    %c0_8 = arith.constant 0 : index
    %11 = vector.load %arg4[%c0_7, %c0_8] : memref<128x32xf32, #tpu.memory_space<vmem>>, vector<128x32xf32>
    %cst_9 = arith.constant dense<0.000000e+00> : vector<8x32xf32>
    %12 = tpu.matmul %10, %11, %cst_9 {dimension_numbers = #tpu.dot_dimension_numbers<[1], [0], [0], [1], [0, 0, 1, 1], [], []>} : vector<8x128xf32>, vector<128x32xf32>, vector<8x32xf32> -> vector<8x32xf32>
    %c0_10 = arith.constant 0 : index
    %c0_11 = arith.constant 0 : index
    %13 = vector.load %arg5[%c0_10, %c0_11] : memref<1x32xf32, #tpu.memory_space<vmem>>, vector<1x32xf32>
    %14 = vector.broadcast %13 : vector<1x32xf32> to vector<8x32xf32>
    %15 = arith.addf %12, %14 : vector<8x32xf32>
    %cst_12 = arith.constant 0.000000e+00 : f32
    %16 = vector.broadcast %cst_12 : f32 to vector<8x32xf32>
    %17 = arith.cmpf ogt, %15, %16 : vector<8x32xf32>
    %cst_13 = arith.constant 0.00999999977 : f32
    %18 = vector.broadcast %cst_13 : f32 to vector<8x32xf32>
    %19 = arith.mulf %18, %15 : vector<8x32xf32>
    %20 = arith.select %17, %15, %19 : vector<8x32xi1>, vector<8x32xf32>
    %c0_14 = arith.constant 0 : index
    %c0_15 = arith.constant 0 : index
    %21 = vector.load %arg6[%c0_14, %c0_15] : memref<32x8xf32, #tpu.memory_space<vmem>>, vector<32x8xf32>
    %cst_16 = arith.constant dense<0.000000e+00> : vector<8x8xf32>
    %22 = tpu.matmul %20, %21, %cst_16 {dimension_numbers = #tpu.dot_dimension_numbers<[1], [0], [0], [1], [0, 0, 1, 1], [], []>} : vector<8x32xf32>, vector<32x8xf32>, vector<8x8xf32> -> vector<8x8xf32>
    %c0_17 = arith.constant 0 : index
    %c0_18 = arith.constant 0 : index
    %23 = vector.load %arg7[%c0_17, %c0_18] : memref<1x8xf32, #tpu.memory_space<vmem>>, vector<1x8xf32>
    %24 = vector.broadcast %23 : vector<1x8xf32> to vector<8x8xf32>
    %25 = arith.addf %22, %24 : vector<8x8xf32>
    %c0_19 = arith.constant 0 : index
    %c0_20 = arith.constant 0 : index
    %26 = vector.load %arg8[%c0_19, %c0_20] : memref<8x8xf32, #tpu.memory_space<vmem>>, vector<8x8xf32>
    tpu.vector_store %arg8[%c0_19, %c0_20], %25 {strides = array<i32>} : memref<8x8xf32, #tpu.memory_space<vmem>>, vector<8x8xf32>,
    return
  }
  func.func @transform_0(%arg0: i32) -> (i32, i32) {
    %c0_i32 = arith.constant 0 : i32
    %c0_i32_0 = arith.constant 0 : i32
    return %arg0, %c0_i32 : i32, i32
  }
  func.func @transform_1(%arg0: i32) -> (i32, i32) {
    %c0_i32 = arith.constant 0 : i32
    %c0_i32_0 = arith.constant 0 : i32
    %c0_i32_1 = arith.constant 0 : i32
    return %c0_i32, %c0_i32_0 : i32, i32
  }
  func.func @transform_2(%arg0: i32) -> (i32, i32) {
    %c0_i32 = arith.constant 0 : i32
    %c0_i32_0 = arith.constant 0 : i32
    %c0_i32_1 = arith.constant 0 : i32
    return %c0_i32, %c0_i32_0 : i32, i32
  }
  func.func @transform_3(%arg0: i32) -> (i32, i32) {
    %c0_i32 = arith.constant 0 : i32
    %c0_i32_0 = arith.constant 0 : i32
    %c0_i32_1 = arith.constant 0 : i32
    return %c0_i32, %c0_i32_0 : i32, i32
  }
  func.func @transform_4(%arg0: i32) -> (i32, i32) {
    %c0_i32 = arith.constant 0 : i32
    %c0_i32_0 = arith.constant 0 : i32
    %c0_i32_1 = arith.constant 0 : i32
    return %c0_i32, %c0_i32_0 : i32, i32
  }
  func.func @transform_5(%arg0: i32) -> (i32, i32) {
    %c0_i32 = arith.constant 0 : i32
    %c0_i32_0 = arith.constant 0 : i32
    %c0_i32_1 = arith.constant 0 : i32
    return %c0_i32, %c0_i32_0 : i32, i32
  }
  func.func @transform_6(%arg0: i32) -> (i32, i32) {
    %c0_i32 = arith.constant 0 : i32
    %c0_i32_0 = arith.constant 0 : i32
    %c0_i32_1 = arith.constant 0 : i32
    return %c0_i32, %c0_i32_0 : i32, i32
  }
  func.func @transform_7(%arg0: i32) -> (i32, i32) {
    %c0_i32 = arith.constant 0 : i32
    %c0_i32_0 = arith.constant 0 : i32
    return %arg0, %c0_i32 : i32, i32
  }
}

</mosaic_0001>

<bundles_post_ra>
// kernel: classifier_forward.1
= control target key start
LH: loop header
LB: loop body
LE: loop exit
PB: predicated region body
PF: predicated region fallthrough
CT: control target
= control target key end

     0   :  { %v436_v0 = vmov 0.0   ;;  %vm437_vm0 = vmmov 0   ;;  %vm230_vm3 = vcmask 261120   ;;  %vm304_vm4 = vcmask 64512   ;;  %s643_s1 = inlined_call_operand.vmem [shape: f32[128,128], index: 1, kind: input, shape index: {}]   ;;  %s644_s3 = inlined_call_operand.vmem [shape: f32[128,32], index: 3, kind: input, shape index: {}]   ;;  %s645_s0 = inlined_call_operand.vmem [shape: f32[8,128], index: 0, kind: input, shape index: {}]   ;;  %s646_s5 = inlined_call_operand.vmem [shape: f32[32,8], index: 5, kind: input, shape index: {}]   ;;  %s647_s2 = inlined_call_operand.vmem [shape: f32[1,128], index: 2, kind: input, shape index: {}]   ;;  %s648_s4 = inlined_call_operand.vmem [shape: f32[1,32], index: 4, kind: input, shape index: {}]   ;;  %s649_s6 = inlined_call_operand.vmem [shape: f32[1,8], index: 6, kind: input, shape index: {}]   ;;  %s650_s7 = inlined_call_operand.vmem [shape: f32[8,8], index: 7, kind: output, shape index: {}]  }
   0x1   :  { %353 = vmatprep.subr.mxu0 %v436_v0  ;;  %v42_v1 = vld [vmem:[%s643_s1 + $0x78] sm:$0xff]  ;;  %v41_v2 = vld [vmem:[%s643_s1 + $0x70] sm:$0xff]  ;;  %385 = vmatprep.mubr.msk.f32.mxu0 %vm437_vm0, %v436_v0  ;;  %v40_v3 = vld [vmem:[%s643_s1 + $0x68] sm:$0xff] }
   0x2   :  { %354 = vmatpush3.msra.mxu0 %v42_v1  ;;  %388 = vmatprep.subr.mxu1 %v436_v0  ;;  %v39_v4 = vld [vmem:[%s643_s1 + $0x60] sm:$0xff]  ;;  %v138_v5 = vld [vmem:[%s644_s3 + $0x78] sm:$0xff]  ;;  %v137_v7 = vld [vmem:[%s644_s3 + $0x70] sm:$0xff] }
   0x3   :  { %355 = vmatprep.subr.mxu0 %v436_v0  ;;  %420 = vmatprep.mubr.msk.f32.mxu1 %vm437_vm0, %v436_v0  ;;  %v38_v6 = vld [vmem:[%s643_s1 + $0x58] sm:$0xff]  ;;  %v136_v8 = vld [vmem:[%s644_s3 + $0x68] sm:$0xff]  ;;  %v37_v9 = vld [vmem:[%s643_s1 + $0x50] sm:$0xff] }
   0x4   :  { %356 = vmatpush3.msra.mxu0 %v41_v2  ;;  %389 = vmatpush3.msra.mxu1 %v138_v5  ;;  %v135_v10 = vld [vmem:[%s644_s3 + $0x60] sm:$0xff]  ;;  %v36_v11 = vld [vmem:[%s643_s1 + $0x48] sm:$0xff]  ;;  %v134_v12 = vld [vmem:[%s644_s3 + $0x58] sm:$0xff] }
   0x5   :  { %357 = vmatprep.subr.mxu0 %v436_v0  ;;  %390 = vmatprep.subr.mxu1 %v436_v0  ;;  %v35_v13 = vld [vmem:[%s643_s1 + $0x40] sm:$0xff]  ;;  %v133_v14 = vld [vmem:[%s644_s3 + $0x50] sm:$0xff]  ;;  %v34_v15 = vld [vmem:[%s643_s1 + $0x38] sm:$0xff] }
   0x6   :  { %358 = vmatpush3.msra.mxu0 %v40_v3  ;;  %391 = vmatpush3.msra.mxu1 %v137_v7  ;;  %v132_v16 = vld [vmem:[%s644_s3 + $0x48] sm:$0xff]  ;;  %v33_v17 = vld [vmem:[%s643_s1 + $0x30] sm:$0xff]  ;;  %v131_v18 = vld [vmem:[%s644_s3 + $0x40] sm:$0xff] }
   0x7   :  { %359 = vmatprep.subr.mxu0 %v436_v0  ;;  %392 = vmatprep.subr.mxu1 %v436_v0  ;;  %v32_v19 = vld [vmem:[%s643_s1 + $0x28] sm:$0xff]  ;;  %v130_v20 = vld [vmem:[%s644_s3 + $0x38] sm:$0xff]  ;;  %v31_v21 = vld [vmem:[%s643_s1 + $0x20] sm:$0xff] }
   0x8   :  { %360 = vmatpush3.msra.mxu0 %v39_v4  ;;  %393 = vmatpush3.msra.mxu1 %v136_v8  ;;  %v129_v22 = vld [vmem:[%s644_s3 + $0x30] sm:$0xff]  ;;  %v30_v23 = vld [vmem:[%s643_s1 + $0x18] sm:$0xff]  ;;  %v128_v24 = vld [vmem:[%s644_s3 + $0x28] sm:$0xff] }
   0x9   :  { %361 = vmatprep.subr.mxu0 %v436_v0  ;;  %394 = vmatprep.subr.mxu1 %v436_v0  ;;  %v29_v25 = vld [vmem:[%s643_s1 + $0x10] sm:$0xff]  ;;  %v127_v26 = vld [vmem:[%s644_s3 + $0x20] sm:$0xff]  ;;  %v28_v27 = vld [vmem:[%s643_s1 + $0x8] sm:$0xff] }
   0xa   :  { %362 = vmatpush3.msra.mxu0 %v38_v6  ;;  %395 = vmatpush3.msra.mxu1 %v135_v10  ;;  %v126_v28 = vld [vmem:[%s644_s3 + $0x18] sm:$0xff]  ;;  %v27_v29 = vld [vmem:[%s643_s1] sm:$0xff]  ;;  %v125_v31 = vld [vmem:[%s644_s3 + $0x10] sm:$0xff] }
   0xb   :  { %363 = vmatprep.subr.mxu0 %v436_v0  ;;  %396 = vmatprep.subr.mxu1 %v436_v0  ;;  %v26_v30 = vld [vmem:[%s645_s0] sm:$0xff]  ;;  %v124_v32 = vld [vmem:[%s644_s3 + $0x8] sm:$0xff]  ;;  %v222_v34 = vld [vmem:[%s646_s5 + $0x18] sm:$0xff] }
   0xc   :  { %364 = vmatpush3.msra.mxu0 %v37_v9  ;;  %397 = vmatpush3.msra.mxu1 %v134_v12  ;;  %v123_v33 = vld [vmem:[%s644_s3] sm:$0xff]  ;;  %v221_v41 = vld [vmem:[%s646_s5 + $0x10] sm:$0xff]  ;;  %v220_v42 = vld [vmem:[%s646_s5 + $0x8] sm:$0xff] }
   0xd   :  { %365 = vmatprep.subr.mxu0 %v436_v0  ;;  %398 = vmatprep.subr.mxu1 %v436_v0  ;;  %v310_v35 = vld [vmem:[%s647_s2] ss:$0 sm:$0xff] }
   0xe   :  { %366 = vmatpush3.msra.mxu0 %v36_v11  ;;  %399 = vmatpush3.msra.mxu1 %v133_v14  ;;  %v219_v43 = vld [vmem:[%s646_s5] sm:$0xff] }
   0xf   :  { %367 = vmatprep.subr.mxu0 %v436_v0  ;;  %400 = vmatprep.subr.mxu1 %v436_v0  ;;  %v311_v44 = vld [vmem:[%s648_s4] ss:$0 sm:$0xff] }
  0x10   :  { %368 = vmatpush3.msra.mxu0 %v35_v13  ;;  %401 = vmatpush3.msra.mxu1 %v132_v16  ;;  %v312_v50 = vld [vmem:[%s649_s6] ss:$0 sm:$0xff] }
  0x11   :  { %369 = vmatprep.subr.mxu0 %v436_v0  ;;  %402 = vmatprep.subr.mxu1 %v436_v0 }
  0x12   :  { %370 = vmatpush3.msra.mxu0 %v34_v15  ;;  %403 = vmatpush3.msra.mxu1 %v131_v18 }
  0x13   :  { %371 = vmatprep.subr.mxu0 %v436_v0  ;;  %404 = vmatprep.subr.mxu1 %v436_v0 }
  0x14   :  { %372 = vmatpush3.msra.mxu0 %v33_v17  ;;  %405 = vmatpush3.msra.mxu1 %v130_v20 }
  0x15   :  { %373 = vmatprep.subr.mxu0 %v436_v0  ;;  %406 = vmatprep.subr.mxu1 %v436_v0 }
  0x16   :  { %374 = vmatpush3.msra.mxu0 %v32_v19  ;;  %407 = vmatpush3.msra.mxu1 %v129_v22 }
  0x17   :  { %375 = vmatprep.subr.mxu0 %v436_v0  ;;  %408 = vmatprep.subr.mxu1 %v436_v0 }
  0x18   :  { %376 = vmatpush3.msra.mxu0 %v31_v21  ;;  %409 = vmatpush3.msra.mxu1 %v128_v24 }
  0x19   :  { %377 = vmatprep.subr.mxu0 %v436_v0  ;;  %410 = vmatprep.subr.mxu1 %v436_v0 }
  0x1a   :  { %378 = vmatpush3.msra.mxu0 %v30_v23  ;;  %411 = vmatpush3.msra.mxu1 %v127_v26 }
  0x1b   :  { %379 = vmatprep.subr.mxu0 %v436_v0  ;;  %412 = vmatprep.subr.mxu1 %v436_v0 }
  0x1c   :  { %380 = vmatpush3.msra.mxu0 %v29_v25  ;;  %413 = vmatpush3.msra.mxu1 %v126_v28 }
  0x1d   :  { %381 = vmatprep.subr.mxu0 %v436_v0  ;;  %414 = vmatprep.subr.mxu1 %v436_v0 }
  0x1e   :  { %382 = vmatpush3.msra.mxu0 %v28_v27  ;;  %415 = vmatpush3.msra.mxu1 %v125_v31 }
  0x1f   :  { %383 = vmatprep.subr.mxu0 %v436_v0  ;;  %416 = vmatprep.subr.mxu1 %v436_v0 }
  0x20   :  { %384 = vmatpush3.msra.mxu0 %v27_v29  ;;  %417 = vmatpush3.msra.mxu1 %v124_v32 }
  0x21   :  { %386 = vmatmul.mubr.f32.vlgmr.msra.gmra.mxu0 %v26_v30  ;;  %423 = vmatprep.subr.mxu0 %v436_v0 }
  0x22   :  { %431 = vmatprep.mubr.msk.f32.mxu0 %vm437_vm0, %v436_v0  ;;  %418 = vmatprep.subr.mxu1 %v436_v0 }
  0x23   :  { %419 = vmatpush3.msra.mxu1 %v123_v33  ;;  %424 = vmatpush3.msra.mxu0 %v222_v34 }
  0x24   :  { %425 = vmatprep.subr.mxu0 %v436_v0 }
  0x25   :  { %426 = vmatpush3.msra.mxu0 %v221_v41 }
  0x26   :  { %427 = vmatprep.subr.mxu0 %v436_v0 }
  0x27   :  { %428 = vmatpush3.msra.mxu0 %v220_v42 }
  0x28   :  { %429 = vmatprep.subr.mxu0 %v436_v0 }
  0x29   :  { %430 = vmatpush3.msra.mxu0 %v219_v43 }
  0xe1   :  { %v116_v36 = vpop.f32.mrf.mxu0 }
  0xe2   :  { %v117_v37 = vadd.f32 %v310_v35, %v116_v36 }
  0xe3   :  { %v387_v38 = vpop.f32.mrf.mxu0 }
  0xe4   :  { %v121_v39 = vmul.f32 0.01, %v117_v37  ;;  %vm120_vm1 = vcmp.gt.f32.partialorder %v117_v37, 0.0 }
  0xe6   :  { %v122_v40 = vsel %vm120_vm1, %v117_v37, %v121_v39 }
  0xe7   :  { %421 = vmatmul.mubr.f32.vlgmr.msra.gmra.mxu1 %v122_v40 }
 0x1a7   :  { %v212_v45 = vpop.f32.mrf.mxu1 }
 0x1a8   :  { %v213_v46 = vadd.f32 %v311_v44, %v212_v45 }
 0x1a9   :  { %v422_v47 = vpop.f32.mrf.mxu1 }
 0x1aa   :  { %vm216_vm2 = vcmp.gt.f32.partialorder %v213_v46, 0.0  ;;  %v217_v48 = vmul.f32 0.01, %v213_v46 }
 0x1ac   :  { %v218_v49 = vsel %vm216_vm2, %v213_v46, %v217_v48 }
 0x1ad   :  { %432 = vmatmul.mubr.msk.f32.vlgmr.msra.gmra.mxu0 %vm230_vm3, %v218_v49 }
 0x26d   :  { %v300_v51 = vpop.f32.mrf.mxu0 }
 0x26e   :  { %v301_v52 = vadd.f32 %v312_v50, %v300_v51 }
 0x26f   :  { %v433_v53 = vpop.f32.mrf.mxu0 }
 0x270   :  { %305 = vst.msk [vmem:[%s650_s7] sm:$0xff] %vm304_vm4, %v301_v52 }

</bundles_post_ra>
